<compile_context>
chip_gen: v6e
topology: v6e:2x2x1
jax: 0.10.0
libtpu: 0.0.40
codegen_flags: <defaults>
</compile_context>

<pallas_src>
import functools

import jax
import jax.numpy as jnp
from jax import lax
from jax.experimental import pallas as pl
from jax.experimental.pallas import tpu as pltpu


def _round_up(x, m):
    return ((x + m - 1) // m) * m


# ------------------------------- Pallas kernel --------------------------------
def _tcn_fused_kernel(x_ref, w1_ref, b1_ref, w2_ref, b2_ref, o_ref):
    """Fused (causal conv1xK + bias + ELU) x 2 for a block of TM independent rows.

    x_ref : (TM, Din)     channels-last rows, flattened lane-dense (bf16)
    w1_ref: (Din,  Dmid)  banded (block-Toeplitz) layer-1 weights (bf16)
    b1_ref: (1, Dmid)     layer-1 bias tiled over W1 (f32)
    w2_ref: (Dmid, Dout)  banded layer-2 weights (bf16)
    b2_ref: (1, Dout)     layer-2 bias tiled over W2 (f32)
    o_ref : (TM, Dout)    f32 output
    """

    def elu(v):
        # ELU(alpha=1).  exp(min(v,0)) - 1 (instead of expm1) for guaranteed Mosaic
        # lowering; abs error vs expm1 is ~1 ulp of 1.0, far below test tolerance.
        return jnp.where(v > 0.0, v, jnp.exp(jnp.minimum(v, 0.0)) - 1.0)

    # bf16 x bf16 -> f32 accumulation: one MXU pass (no HIGHEST multi-pass).
    h = jnp.dot(x_ref[...], w1_ref[...], preferred_element_type=jnp.float32)
    h = elu(h + b1_ref[...])        # f32 epilogue (safe on v5e: no bf16 VPU/EUP)
    # Dropout: identity in eval mode.
    # TODO(synk): training-mode dropout (would need pltpu.prng_* masks) not implemented.
    y = jnp.dot(h.astype(w2_ref.dtype), w2_ref[...],
                preferred_element_type=jnp.float32)
    y = elu(y + b2_ref[...])
    o_ref[...] = y.astype(o_ref.dtype)


# --------------------------- block / core heuristics ---------------------------
def _tensorcore_count():
    """Best-effort TensorCores-per-chip (v7x=2, v5e/v6e=1); conservative default 1."""
    objs = []
    try:
        objs.append(pltpu.get_tpu_info())
    except Exception:
        pass
    try:
        devs = jax.devices()
        if devs:
            objs.append(devs[0])
    except Exception:
        pass
    for obj in objs:
        for attr in ("num_cores", "core_count", "num_tensorcores", "tensorcore_count"):
            v = getattr(obj, attr, None)
            if isinstance(v, int) and 0 < v <= 16:
                return v
    return 1


def _choose_block_rows(m, max_block_rows, num_tc):
    """Largest row tile <= max_block_rows (multiple of 8).  Only on multi-TensorCore
    chips (v7x) force the block count to a multiple of the core count, and only when
    each core gets a reasonably sized tile (otherwise the split is pure overhead)."""
    tm = min(max_block_rows, _round_up(m, 8))
    if num_tc > 1 and m >= num_tc * 64:
        n_blocks = pl.cdiv(m, tm)
        if n_blocks % num_tc != 0:
            n_blocks = _round_up(n_blocks, num_tc)
            tm = max(8, _round_up(pl.cdiv(m, n_blocks), 8))
    return tm


def _fused_pallas_call(x_rows, w1b, b1f, w2b, b2f, out_dtype, *, max_block_rows=512):
    m, d_in = x_rows.shape
    d_mid = w1b.shape[1]
    d_out = w2b.shape[1]

    tm = _choose_block_rows(m, max_block_rows, _tensorcore_count())

    return pl.pallas_call(
        _tcn_fused_kernel,
        out_shape=jax.ShapeDtypeStruct((m, d_out), out_dtype),
        grid=(pl.cdiv(m, tm),),
        in_specs=[
            pl.BlockSpec((tm, d_in), lambda i: (i, 0)),   # row block (double-buffered)
            # Weights/biases are grid-invariant: keep ONE resident VMEM copy each
            # (default pipelining would allocate two -> matters on v7x's 64 MiB VMEM
            # once W*C grows).
            pl.BlockSpec((d_in, d_mid), lambda i: (0, 0), pipeline_mode=pl.Buffered(1)),
            pl.BlockSpec((1, d_mid), lambda i: (0, 0), pipeline_mode=pl.Buffered(1)),
            pl.BlockSpec((d_mid, d_out), lambda i: (0, 0), pipeline_mode=pl.Buffered(1)),
            pl.BlockSpec((1, d_out), lambda i: (0, 0), pipeline_mode=pl.Buffered(1)),
        ],
        out_specs=pl.BlockSpec((tm, d_out), lambda i: (i, 0)),
        compiler_params=pltpu.CompilerParams(
            dimension_semantics=("parallel",),
            # Explicit scoped-VMEM budget: raises v5e's 16 MiB default, stays well
            # inside v7x's 64 MiB physical VMEM.  Actual use here is ~2 MiB.
            vmem_limit_bytes=32 * 1024 * 1024,
        ),
    )(x_rows, w1b, b1f, w2b, b2f)


# ------------------------------ TCNBlock wrapper -------------------------------
def _conv_out_len(w_in, ksize, stride, padding, dilation):
    return (w_in + padding - dilation * (ksize - 1) - 1) // stride + 1


def _banded_conv_weight(w_kio, w_in, stride, padding, dilation):
    """Fold causal left-pad + K-tap dilated/strided conv into one dense matrix.

    w_kio: (K, C_in, C_out) -> (W_in*C_in, W_out*C_out) block-Toeplitz matrix so that
    x_flat @ big == causal conv along W in flattened channels-last (w, c) layout.
    Built with one vectorized einsum (no O(W_out*K) .at[].set calls).
    """
    ksize, cin, cout = w_kio.shape
    w_out = _conv_out_len(w_in, ksize, stride, padding, dilation)
    # src[k, wo] = input position read by tap k of output wo (< 0 == causal zero pad).
    src = (jnp.arange(w_out)[None, :] * stride
           + jnp.arange(ksize)[:, None] * dilation - padding)                 # (K, Wout)
    sel = (jnp.arange(w_in)[:, None, None] == src[None]).astype(w_kio.dtype)  # (Win,K,Wout)
    big = jnp.einsum("xkw,kio->xiwo", sel, w_kio,
                     precision=lax.Precision.HIGHEST)   # tiny weight-side prep, exact
    return big.reshape(w_in * cin, w_out * cout)


def _pad2d(a, rows, cols):
    pr, pc = rows - a.shape[0], cols - a.shape[1]
    return a if (pr == 0 and pc == 0) else jnp.pad(a, ((0, pr), (0, pc)))


def tcn_block_forward(x_nchw, params, *, kernel_size, stride, padding, dilation,
                      compute_dtype=jnp.bfloat16):
    """Exact TCNBlock forward (eval mode). x_nchw: (N, C_in, H, W) -> (N, C_out, H2, W2).

    Matmul operands run in `compute_dtype` (bf16 default) with f32 accumulation.
    """
    n, c_in, hh, ww = x_nchw.shape
    c1 = params["w1"].shape[-1]
    c2 = params["w2"].shape[-1]

    w1_len = _conv_out_len(ww, kernel_size, stride, padding, dilation)
    w2_len = _conv_out_len(w1_len, kernel_size, stride, padding, dilation)
    h1 = (hh - 1) // stride + 1          # Conv2d strides H too (kernel height == 1)
    h2 = (h1 - 1) // stride + 1

    # kh == 1 => the H stride is pure row subsampling: each final output row depends on
    # exactly one input row, so gather the surviving rows up front.
    if stride > 1:
        x_nchw = x_nchw[:, :, jnp.arange(h2) * (stride * stride), :]

    out_dtype = x_nchw.dtype

    # Lane-dense padded widths (multiples of 128: full vregs, full MXU K dims).
    d_in = _round_up(ww * c_in, 128)
    d_mid = _round_up(w1_len * c1, 128)
    d_out = w2_len * c2

    # NCHW -> channels-last rows, flattened lane-dense as (row, w*C_in).
    # TODO(synk): when stacking TCN blocks, chain them channels-last to skip these
    # wrapper transposes (each one is an extra full HBM pass in a mem-bound regime).
    x_rows = jnp.transpose(x_nchw, (0, 2, 3, 1)).reshape(n * h2, ww * c_in)
    x_rows = _pad2d(x_rows, n * h2, d_in).astype(compute_dtype)

    # Fold pad + conv taps into dense banded weights (weights only; tiny).
    w1b = _pad2d(_banded_conv_weight(params["w1"], ww, stride, padding, dilation),
                 d_in, d_mid).astype(compute_dtype)
    w2b = _pad2d(_banded_conv_weight(params["w2"], w1_len, stride, padding, dilation),
                 d_mid, d_out).astype(compute_dtype)
    b1f = _pad2d(jnp.tile(params["b1"].reshape(1, c1), (1, w1_len)), 1, d_mid)  # f32
    b2f = jnp.tile(params["b2"].reshape(1, c2), (1, w2_len))                    # f32

    y = _fused_pallas_call(x_rows, w1b, b1f, w2b, b2f, out_dtype)   # (N*h2, W2*C2)
    return jnp.transpose(y.reshape(n, h2, w2_len, c2), (0, 3, 1, 2))


def init_params(key, in_channels, out_channels, kernel_size):
    """Deterministic Conv2d-style init. Weights stored as (K, C_in, C_out)."""
    k1, k2, k3, k4 = jax.random.split(key, 4)
    bound1 = 1.0 / jnp.sqrt(in_channels * kernel_size)
    bound2 = 1.0 / jnp.sqrt(out_channels * kernel_size)
    return {
        "w1": jax.random.uniform(k1, (kernel_size, in_channels, out_channels),
                                 jnp.float32, -bound1, bound1),
        "b1": jax.random.uniform(k2, (out_channels,), jnp.float32, -bound1, bound1),
        "w2": jax.random.uniform(k3, (kernel_size, out_channels, out_channels),
                                 jnp.float32, -bound2, bound2),
        "b2": jax.random.uniform(k4, (out_channels,), jnp.float32, -bound2, bound2),
    }


# ---------------------------- pure-JAX reference -------------------------------
def _reference_forward(x_nchw, params, *, kernel_size, stride, padding, dilation,
                       compute_dtype=jnp.bfloat16):
    """Reference with the SAME operand precision as the kernel (bf16 multiplies,
    f32 accumulation and epilogue), so the comparison isolates kernel correctness."""
    def conv_elu(x, w_kio, b):
        x = jnp.pad(x, ((0, 0), (0, 0), (0, 0), (padding, 0)))   # ZeroPad2d((p,0,0,0))
        w_oihw = jnp.transpose(w_kio, (2, 1, 0))[:, :, None, :]  # (C_out, C_in, 1, K)
        y = lax.conv_general_dilated(
            x.astype(compute_dtype), w_oihw.astype(compute_dtype),
            window_strides=(stride, stride), padding="VALID",
            rhs_dilation=(dilation, dilation),
            dimension_numbers=("NCHW", "OIHW", "NCHW"),
            preferred_element_type=jnp.float32)
        return jax.nn.elu(y + b.reshape(1, -1, 1, 1))

    y = conv_elu(x_nchw, params["w1"], params["b1"])
    return conv_elu(y, params["w2"], params["b2"])


# -------------------------------------- main -----------------------------------
if __name__ == "__main__":
    # Module hyper-parameters (standard causal TCN setup).
    in_channels, out_channels = 4, 8
    kernel_size, stride, dilation = 3, 1, 1
    padding = (kernel_size - 1) * dilation  # causal left pad
    dropout = 0.1                           # identity in eval mode

    batch, height, width = 2, 4, 16
    key = jax.random.PRNGKey(0)
    kx, kp = jax.random.split(key)
    x = jax.random.normal(kx, (batch, in_channels, height, width), jnp.float32)
    params = init_params(kp, in_channels, out_channels, kernel_size)

    fwd = jax.jit(functools.partial(
        tcn_block_forward, kernel_size=kernel_size, stride=stride,
        padding=padding, dilation=dilation))
    out = jax.block_until_ready(fwd(x, params))

    ref = jax.block_until_ready(
        _reference_forward(x, params, kernel_size=kernel_size, stride=stride,
                           padding=padding, dilation=dilation))

    assert out.shape == ref.shape == (batch, out_channels, height, width), \
        (out.shape, ref.shape)
    # bf16-operand matmuls: tolerance covers f32 accumulation-order differences plus
    # the (rare) one-bf16-ulp double-rounding of the intermediate activation.
    max_err = float(jnp.abs(out - ref).max())
    assert jnp.allclose(out, ref, atol=1e-2, rtol=1e-2), max_err
    print("KERNEL_OK")
</pallas_src>

<mosaic_0001>
module attributes {stable_mosaic.version = 11 : i64} {
  func.func @_tcn_fused_kernel(%arg0: i32, %arg1: memref<8x128xbf16, #tpu.memory_space<vmem>>, %arg2: memref<128x128xbf16, #tpu.memory_space<vmem>>, %arg3: memref<1x128xf32, #tpu.memory_space<vmem>>, %arg4: memref<128x128xbf16, #tpu.memory_space<vmem>>, %arg5: memref<1x128xf32, #tpu.memory_space<vmem>>, %arg6: memref<8x128xf32, #tpu.memory_space<vmem>>) attributes {dimension_semantics = [#tpu.dimension_semantics<parallel>], iteration_bounds = array<i64: 1>, scalar_prefetch = 0 : i64, scratch_operands = 0 : i64, tpu.core_type = #tpu.core_type<tc>, window_params = [{transform_indices = @transform_0, window_bounds = array<i64: 8, 128>}, {pipeline_mode = #tpu.pipeline_mode<synchronous>, transform_indices = @transform_1, window_bounds = array<i64: 128, 128>}, {pipeline_mode = #tpu.pipeline_mode<synchronous>, transform_indices = @transform_2, window_bounds = array<i64: 1, 128>}, {pipeline_mode = #tpu.pipeline_mode<synchronous>, transform_indices = @transform_3, window_bounds = array<i64: 128, 128>}, {pipeline_mode = #tpu.pipeline_mode<synchronous>, transform_indices = @transform_4, window_bounds = array<i64: 1, 128>}, {transform_indices = @transform_5, window_bounds = array<i64: 8, 128>}]} {
    %c0 = arith.constant 0 : index
    %c0_0 = arith.constant 0 : index
    %0 = vector.load %arg1[%c0, %c0_0] : memref<8x128xbf16, #tpu.memory_space<vmem>>, vector<8x128xbf16>
    %c0_1 = arith.constant 0 : index
    %c0_2 = arith.constant 0 : index
    %1 = vector.load %arg2[%c0_1, %c0_2] : memref<128x128xbf16, #tpu.memory_space<vmem>>, vector<128x128xbf16>
    %cst = arith.constant dense<0.000000e+00> : vector<8x128xf32>
    %2 = tpu.matmul %0, %1, %cst {dimension_numbers = #tpu.dot_dimension_numbers<[1], [0], [0], [1], [0, 0, 1, 1], [], []>} : vector<8x128xbf16>, vector<128x128xbf16>, vector<8x128xf32> -> vector<8x128xf32>
    %c0_3 = arith.constant 0 : index
    %c0_4 = arith.constant 0 : index
    %3 = vector.load %arg3[%c0_3, %c0_4] : memref<1x128xf32, #tpu.memory_space<vmem>>, vector<1x128xf32>
    %4 = vector.broadcast %3 : vector<1x128xf32> to vector<8x128xf32>
    %5 = arith.addf %2, %4 : vector<8x128xf32>
    %cst_5 = arith.constant 0.000000e+00 : f32
    %6 = vector.broadcast %cst_5 : f32 to vector<8x128xf32>
    %7 = arith.cmpf ogt, %5, %6 : vector<8x128xf32>
    %cst_6 = arith.constant 0.000000e+00 : f32
    %8 = vector.broadcast %cst_6 : f32 to vector<8x128xf32>
    %9 = arith.minimumf %5, %8 : vector<8x128xf32>
    %10 = math.exp %9 : vector<8x128xf32>
    %cst_7 = arith.constant 1.000000e+00 : f32
    %11 = vector.broadcast %cst_7 : f32 to vector<8x128xf32>
    %12 = arith.subf %10, %11 : vector<8x128xf32>
    %13 = arith.select %7, %5, %12 : vector<8x128xi1>, vector<8x128xf32>
    %14 = arith.truncf %13 : vector<8x128xf32> to vector<8x128xbf16>
    %c0_8 = arith.constant 0 : index
    %c0_9 = arith.constant 0 : index
    %15 = vector.load %arg4[%c0_8, %c0_9] : memref<128x128xbf16, #tpu.memory_space<vmem>>, vector<128x128xbf16>
    %cst_10 = arith.constant dense<0.000000e+00> : vector<8x128xf32>
    %16 = tpu.matmul %14, %15, %cst_10 {dimension_numbers = #tpu.dot_dimension_numbers<[1], [0], [0], [1], [0, 0, 1, 1], [], []>} : vector<8x128xbf16>, vector<128x128xbf16>, vector<8x128xf32> -> vector<8x128xf32>
    %c0_11 = arith.constant 0 : index
    %c0_12 = arith.constant 0 : index
    %17 = vector.load %arg5[%c0_11, %c0_12] : memref<1x128xf32, #tpu.memory_space<vmem>>, vector<1x128xf32>
    %18 = vector.broadcast %17 : vector<1x128xf32> to vector<8x128xf32>
    %19 = arith.addf %16, %18 : vector<8x128xf32>
    %cst_13 = arith.constant 0.000000e+00 : f32
    %20 = vector.broadcast %cst_13 : f32 to vector<8x128xf32>
    %21 = arith.cmpf ogt, %19, %20 : vector<8x128xf32>
    %cst_14 = arith.constant 0.000000e+00 : f32
    %22 = vector.broadcast %cst_14 : f32 to vector<8x128xf32>
    %23 = arith.minimumf %19, %22 : vector<8x128xf32>
    %24 = math.exp %23 : vector<8x128xf32>
    %cst_15 = arith.constant 1.000000e+00 : f32
    %25 = vector.broadcast %cst_15 : f32 to vector<8x128xf32>
    %26 = arith.subf %24, %25 : vector<8x128xf32>
    %27 = arith.select %21, %19, %26 : vector<8x128xi1>, vector<8x128xf32>
    %c0_16 = arith.constant 0 : index
    %c0_17 = arith.constant 0 : index
    %28 = vector.load %arg6[%c0_16, %c0_17] : memref<8x128xf32, #tpu.memory_space<vmem>>, vector<8x128xf32>
    tpu.vector_store %arg6[%c0_16, %c0_17], %27 {strides = array<i32>} : memref<8x128xf32, #tpu.memory_space<vmem>>, vector<8x128xf32>,
    return
  }
  func.func @transform_0(%arg0: i32) -> (i32, i32) {
    %c0_i32 = arith.constant 0 : i32
    %c0_i32_0 = arith.constant 0 : i32
    return %arg0, %c0_i32 : i32, i32
  }
  func.func @transform_1(%arg0: i32) -> (i32, i32) {
    %c0_i32 = arith.constant 0 : i32
    %c0_i32_0 = arith.constant 0 : i32
    %c0_i32_1 = arith.constant 0 : i32
    return %c0_i32, %c0_i32_0 : i32, i32
  }
  func.func @transform_2(%arg0: i32) -> (i32, i32) {
    %c0_i32 = arith.constant 0 : i32
    %c0_i32_0 = arith.constant 0 : i32
    %c0_i32_1 = arith.constant 0 : i32
    return %c0_i32, %c0_i32_0 : i32, i32
  }
  func.func @transform_3(%arg0: i32) -> (i32, i32) {
    %c0_i32 = arith.constant 0 : i32
    %c0_i32_0 = arith.constant 0 : i32
    %c0_i32_1 = arith.constant 0 : i32
    return %c0_i32, %c0_i32_0 : i32, i32
  }
  func.func @transform_4(%arg0: i32) -> (i32, i32) {
    %c0_i32 = arith.constant 0 : i32
    %c0_i32_0 = arith.constant 0 : i32
    %c0_i32_1 = arith.constant 0 : i32
    return %c0_i32, %c0_i32_0 : i32, i32
  }
  func.func @transform_5(%arg0: i32) -> (i32, i32) {
    %c0_i32 = arith.constant 0 : i32
    %c0_i32_0 = arith.constant 0 : i32
    return %arg0, %c0_i32 : i32, i32
  }
}

</mosaic_0001>

<bundles_post_ra>
// kernel: tcn_block_forward.1
= control target key start
LH: loop header
LB: loop body
LE: loop exit
PB: predicated region body
PF: predicated region fallthrough
CT: control target
= control target key end

     0   :  { %v362_v0 = vmov 0.0   ;;  %vm363_vm0 = vmmov 0   ;;  %s454_s1 = inlined_call_operand.vmem [shape: bf16[128,128], index: 1, kind: input, shape index: {}]   ;;  %s455_s3 = inlined_call_operand.vmem [shape: bf16[128,128], index: 3, kind: input, shape index: {}]   ;;  %s456_s0 = inlined_call_operand.vmem [shape: bf16[8,128], index: 0, kind: input, shape index: {}]   ;;  %s457_s2 = inlined_call_operand.vmem [shape: f32[1,128], index: 2, kind: input, shape index: {}]   ;;  %s458_s4 = inlined_call_operand.vmem [shape: f32[1,128], index: 4, kind: input, shape index: {}]   ;;  %s459_s5 = inlined_call_operand.vmem [shape: f32[8,128], index: 5, kind: output, shape index: {}]  }
   0x1   :  { %300 = vmatprep.subr.bf16.mxu0 %v362_v0  ;;  %v342_v1 = vld [vmem:[%s454_s1 + $0x38] sm:$0xff]   ;;  %316 = vmatprep.mubr.msk.bf16.mxu0 %vm363_vm0, %v362_v0  ;;  %v343_v2 = vld [vmem:[%s454_s1 + $0x30] sm:$0xff]   ;;  %v344_v3 = vld [vmem:[%s454_s1 + $0x28] sm:$0xff]  }
   0x2   :  { %320 = vmatprep.subr.bf16.mxu1 %v362_v0  ;;  %336 = vmatprep.mubr.msk.bf16.mxu1 %vm363_vm0, %v362_v0  ;;  %v350_v4 = vld [vmem:[%s455_s3 + $0x38] sm:$0xff]   ;;  %v345_v5 = vld [vmem:[%s454_s1 + $0x20] sm:$0xff]   ;;  %v351_v6 = vld [vmem:[%s455_s3 + $0x30] sm:$0xff]  }
   0x3   :  { %301 = vmatpush3.bf16.msra.mxu0 %v342_v1  ;;  %321 = vmatpush3.bf16.msra.mxu1 %v350_v4  ;;  %v346_v7 = vld [vmem:[%s454_s1 + $0x18] sm:$0xff]   ;;  %v347_v8 = vld [vmem:[%s454_s1 + $0x10] sm:$0xff]   ;;  %v348_v9 = vld [vmem:[%s454_s1 + $0x8] sm:$0xff]  }
   0x4   :  { %302 = vmatprep.subr.bf16.mxu0 %v362_v0  ;;  %322 = vmatprep.subr.bf16.mxu1 %v362_v0  ;;  %v349_v10 = vld [vmem:[%s454_s1] sm:$0xff]   ;;  %v352_v12 = vld [vmem:[%s455_s3 + $0x28] sm:$0xff]   ;;  %v354_v14 = vld [vmem:[%s455_s3 + $0x18] sm:$0xff]  }
   0x5   :  { %v21_v11 = vld [vmem:[%s456_s0] sm:$0xf]  ;;  %v355_v15 = vld [vmem:[%s455_s3 + $0x10] sm:$0xff]   ;;  %v356_v16 = vld [vmem:[%s455_s3 + $0x8] sm:$0xff]  }
   0x6   :  { %v353_v13 = vld [vmem:[%s455_s3 + $0x20] sm:$0xff]  }
   0x7   :  { %303 = vmatpush3.bf16.msra.mxu0 %v343_v2  ;;  %323 = vmatpush3.bf16.msra.mxu1 %v351_v6  ;;  %v357_v17 = vld [vmem:[%s455_s3] sm:$0xff]  }
   0x8   :  { %304 = vmatprep.subr.bf16.mxu0 %v362_v0  ;;  %324 = vmatprep.subr.bf16.mxu1 %v362_v0  ;;  %v262_v18 = vld [vmem:[%s457_s2] ss:$0 sm:$0xff] }
   0x9   :  { %v272_v30 = vld [vmem:[%s458_s4] ss:$0 sm:$0xff] }
   0xb   :  { %305 = vmatpush3.bf16.msra.mxu0 %v344_v3  ;;  %325 = vmatpush3.bf16.msra.mxu1 %v352_v12 }
   0xc   :  { %306 = vmatprep.subr.bf16.mxu0 %v362_v0  ;;  %326 = vmatprep.subr.bf16.mxu1 %v362_v0 }
   0xf   :  { %307 = vmatpush3.bf16.msra.mxu0 %v345_v5  ;;  %327 = vmatpush3.bf16.msra.mxu1 %v353_v13 }
  0x10   :  { %308 = vmatprep.subr.bf16.mxu0 %v362_v0  ;;  %328 = vmatprep.subr.bf16.mxu1 %v362_v0 }
  0x13   :  { %309 = vmatpush3.bf16.msra.mxu0 %v346_v7  ;;  %329 = vmatpush3.bf16.msra.mxu1 %v354_v14 }
  0x14   :  { %310 = vmatprep.subr.bf16.mxu0 %v362_v0  ;;  %330 = vmatprep.subr.bf16.mxu1 %v362_v0 }
  0x17   :  { %311 = vmatpush3.bf16.msra.mxu0 %v347_v8  ;;  %331 = vmatpush3.bf16.msra.mxu1 %v355_v15 }
  0x18   :  { %312 = vmatprep.subr.bf16.mxu0 %v362_v0  ;;  %332 = vmatprep.subr.bf16.mxu1 %v362_v0 }
  0x1b   :  { %313 = vmatpush3.bf16.msra.mxu0 %v348_v9  ;;  %333 = vmatpush3.bf16.msra.mxu1 %v356_v16 }
  0x1c   :  { %314 = vmatprep.subr.bf16.mxu0 %v362_v0  ;;  %334 = vmatprep.subr.bf16.mxu1 %v362_v0 }
  0x1f   :  { %315 = vmatpush3.bf16.msra.mxu0 %v349_v10  ;;  %335 = vmatpush3.bf16.msra.mxu1 %v357_v17 }
  0x22   :  { %317 = vmatmul.mubr.bf16.vlgmr.msra.gmra.mxu0 %v21_v11 }
  0xe2   :  { %v127_v19 = vpop.f32.mrf.mxu0 }
  0xe3   :  { %v128_v20 = vadd.f32 %v262_v18, %v127_v19 }
  0xe4   :  { %v318_v21 = vpop.f32.mrf.mxu0 }
  0xe5   :  { %v134_v22 = vmin.f32 %v128_v20, 0.0  ;;  %vm133_vm1 = vcmp.gt.f32.partialorder %v128_v20, 0.0 }
  0xe6   :  { %v130_v23 = vpop.f32.mrf.mxu0 }
  0xe7   :  { %v135_v24 = vmul.f32 1.442695, %v134_v22 }
  0xe8   :  { %v319_v25 = vpop.f32.mrf.mxu0 }
  0xe9   :  { %358 = vpow2.f32 %v135_v24 }
  0xf6   :  { %v359_v26 = vpop.eup %358 }
  0xf7   :  { %v271_v27 = vadd.f32 -1.0, %v359_v26 }
  0xf9   :  { %v138_v28 = vsel %vm133_vm1, %v128_v20, %v271_v27 }
  0xfa   :  { %v139_v29 = vpack.c.bf16 %v138_v28, %v138_v28 }
  0xfc   :  { %337 = vmatmul.mubr.bf16.vlgmr.msra.gmra.mxu1 %v139_v29 }
 0x1bc   :  { %v245_v31 = vpop.f32.mrf.mxu1 }
 0x1bd   :  { %v246_v32 = vadd.f32 %v272_v30, %v245_v31 }
 0x1be   :  { %v338_v33 = vpop.f32.mrf.mxu1 }
 0x1bf   :  { %v252_v34 = vmin.f32 %v246_v32, 0.0  ;;  %vm251_vm2 = vcmp.gt.f32.partialorder %v246_v32, 0.0 }
 0x1c0   :  { %v248_v35 = vpop.f32.mrf.mxu1 }
 0x1c1   :  { %v253_v36 = vmul.f32 1.442695, %v252_v34 }
 0x1c2   :  { %v339_v37 = vpop.f32.mrf.mxu1 }
 0x1c3   :  { %360 = vpow2.f32 %v253_v36 }
 0x1d0   :  { %v361_v38 = vpop.eup %360 }
 0x1d1   :  { %v281_v39 = vadd.f32 -1.0, %v361_v38 }
 0x1d3   :  { %v256_v40 = vsel %vm251_vm2, %v246_v32, %v281_v39 }
 0x1d4   :  { %257 = vst [vmem:[%s459_s5] sm:$0xff] %v256_v40 }

</bundles_post_ra>
